<compile_context>
chip_gen: v7x
topology: tpu7x:2x2x1
jax: 0.10.0
libtpu: 0.0.40
codegen_flags: <defaults>
</compile_context>

<pallas_src>
import functools
import math

import jax
import jax.numpy as jnp
from jax.experimental import pallas as pl
from jax.experimental.pallas import tpu as pltpu


# ---------------------------------------------------------------------------
# helpers
# ---------------------------------------------------------------------------
def _pick_tile(dim, pref, align):
    """Largest tile <= pref that divides dim and is `align`-aligned, else full dim."""
    if dim <= pref:
        return dim
    t = (pref // align) * align
    while t >= align:
        if dim % t == 0:
            return t
        t -= align
    # TODO(synk): falls back to the full dimension for awkward sizes; padding
    # would be needed to bound VMEM for pathological M on v7x (64 MiB VMEM).
    return dim


_GELU_C = 0.7978845608028654  # sqrt(2/pi)


def _gelu(x):
    # tanh-approximate GELU (maps to the EUP).
    # TODO(synk): PyTorch nn.GELU defaults to exact erf; tanh-approx used here
    # (and in the in-script reference) to stay on guaranteed Mosaic lowerings.
    return 0.5 * x * (1.0 + jnp.tanh(_GELU_C * (x + 0.044715 * x * x * x)))


# 32 MiB: raises v5e's 16 MiB scoped default, within v7x's 32 MiB scoped default.
_VMEM_LIMIT = 32 * 1024 * 1024


# ---------------------------------------------------------------------------
# Linear: y = x @ W + b   (W pre-transposed to [in, out]; optional fused GELU)
# ---------------------------------------------------------------------------
def _linear_kernel(x_ref, w_ref, b_ref, o_ref, acc_ref, *, activation):
    k = pl.program_id(2)

    @pl.when(k == 0)
    def _():
        acc_ref[...] = jnp.zeros_like(acc_ref)

    acc_ref[...] += jax.lax.dot_general(
        x_ref[...], w_ref[...],
        dimension_numbers=(((1,), (0,)), ((), ())),
        preferred_element_type=jnp.float32)

    @pl.when(k == pl.num_programs(2) - 1)
    def _():
        y = acc_ref[...] + b_ref[...].astype(jnp.float32)
        if activation == "gelu":
            y = _gelu(y)
        o_ref[...] = y.astype(o_ref.dtype)


def linear(x, w_t, b, activation="none", tm_pref=256, tn_pref=512, tk_pref=1024):
    """x: [M, K]; w_t: [K, N] (pre-transposed); b: [N] -> [M, N]."""
    M, K = x.shape
    N = w_t.shape[1]
    tm = _pick_tile(M, tm_pref, 8)
    tn = _pick_tile(N, tn_pref, 128)
    tk = _pick_tile(K, tk_pref, 128)
    grid = (M // tm, N // tn, K // tk)
    return pl.pallas_call(
        functools.partial(_linear_kernel, activation=activation),
        out_shape=jax.ShapeDtypeStruct((M, N), x.dtype),
        grid=grid,
        in_specs=[
            pl.BlockSpec((tm, tk), lambda i, j, k: (i, k)),
            pl.BlockSpec((tk, tn), lambda i, j, k: (k, j)),
            pl.BlockSpec((1, tn), lambda i, j, k: (0, j)),
        ],
        out_specs=pl.BlockSpec((tm, tn), lambda i, j, k: (i, j)),
        scratch_shapes=[pltpu.VMEM((tm, tn), jnp.float32)],
        compiler_params=pltpu.CompilerParams(
            dimension_semantics=("parallel", "parallel", "arbitrary"),
            vmem_limit_bytes=_VMEM_LIMIT),
    )(x, w_t, b.reshape(1, N))


# ---------------------------------------------------------------------------
# Linear fused with residual-add + LayerNorm:  LN(x @ W + b + residual)
# (tn == N so the k==last epilogue sees the whole row.)
# ---------------------------------------------------------------------------
def _linear_res_ln_kernel(x_ref, w_ref, b_ref, r_ref, g_ref, bb_ref, o_ref,
                          acc_ref, *, eps):
    k = pl.program_id(1)

    @pl.when(k == 0)
    def _():
        acc_ref[...] = jnp.zeros_like(acc_ref)

    acc_ref[...] += jax.lax.dot_general(
        x_ref[...], w_ref[...],
        dimension_numbers=(((1,), (0,)), ((), ())),
        preferred_element_type=jnp.float32)

    @pl.when(k == pl.num_programs(1) - 1)
    def _():
        y = acc_ref[...] + b_ref[...].astype(jnp.float32) + r_ref[...].astype(jnp.float32)
        mu = jnp.mean(y, axis=-1, keepdims=True)
        yc = y - mu
        var = jnp.mean(yc * yc, axis=-1, keepdims=True)
        inv = jax.lax.rsqrt(var + eps)
        out = yc * inv * g_ref[...].astype(jnp.float32) + bb_ref[...].astype(jnp.float32)
        o_ref[...] = out.astype(o_ref.dtype)


def linear_residual_layernorm(x, w_t, b, residual, gamma, beta, eps=1e-12,
                              tm_pref=256, tk_pref=1024):
    """LayerNorm(x @ w_t + b + residual); x:[M,K], w_t:[K,N], residual:[M,N]."""
    M, K = x.shape
    N = w_t.shape[1]
    tm = _pick_tile(M, tm_pref, 8)
    tk = _pick_tile(K, tk_pref, 128)
    grid = (M // tm, K // tk)
    return pl.pallas_call(
        functools.partial(_linear_res_ln_kernel, eps=eps),
        out_shape=jax.ShapeDtypeStruct((M, N), x.dtype),
        grid=grid,
        in_specs=[
            pl.BlockSpec((tm, tk), lambda i, k: (i, k)),
            pl.BlockSpec((tk, N), lambda i, k: (k, 0)),
            pl.BlockSpec((1, N), lambda i, k: (0, 0)),
            pl.BlockSpec((tm, N), lambda i, k: (i, 0)),
            pl.BlockSpec((1, N), lambda i, k: (0, 0)),
            pl.BlockSpec((1, N), lambda i, k: (0, 0)),
        ],
        out_specs=pl.BlockSpec((tm, N), lambda i, k: (i, 0)),
        scratch_shapes=[pltpu.VMEM((tm, N), jnp.float32)],
        compiler_params=pltpu.CompilerParams(
            dimension_semantics=("parallel", "arbitrary"),
            vmem_limit_bytes=_VMEM_LIMIT),
    )(x, w_t, b.reshape(1, N), residual, gamma.reshape(1, N), beta.reshape(1, N))


# ---------------------------------------------------------------------------
# Attention: softmax(Q K^T * scale + mask) V for all heads of one (b, q-block).
# Consumes the fused qkv tensor in [B, S, 3H] layout (no head transposes);
# writes a lane-dense [B, S, H] output block with a single wide store.
# ---------------------------------------------------------------------------
def _attn_kernel(q_rows_ref, kv_rows_ref, m_ref, o_ref, *,
                 scale, num_heads, head_dim, hidden):
    mask = m_ref[0].astype(jnp.float32)          # [1, S]
    q_rows = q_rows_ref[0]                       # [tq, 3H]
    kv_rows = kv_rows_ref[0]                     # [S,  3H]
    parts = []
    for h in range(num_heads):                   # static unroll over heads
        off = h * head_dim
        # scale q (tq*dH mults) instead of the [tq, S] score matrix
        q = q_rows[:, off:off + head_dim].astype(jnp.float32) * scale
        k = kv_rows[:, hidden + off:hidden + off + head_dim]
        v = kv_rows[:, 2 * hidden + off:2 * hidden + off + head_dim]
        s = jax.lax.dot_general(
            q.astype(k.dtype), k,
            dimension_numbers=(((1,), (1,)), ((), ())),
            preferred_element_type=jnp.float32)              # [tq, S]
        s = s + mask
        s_max = jnp.max(s, axis=-1, keepdims=True)
        p = jnp.exp(s - s_max)
        denom = jnp.sum(p, axis=-1, keepdims=True)
        ctx = jax.lax.dot_general(
            p.astype(v.dtype), v,
            dimension_numbers=(((1,), (0,)), ((), ())),
            preferred_element_type=jnp.float32)              # [tq, dH]
        # EUP approximate reciprocal instead of a VPU divide
        parts.append(ctx * pl.reciprocal(denom, approx=True))
    o_ref[0] = jnp.concatenate(parts, axis=-1).astype(o_ref.dtype)


def attention(qkv, mask_add_3d, batch, seq, num_heads, hidden):
    """qkv: [B*S, 3H] fused projection output; returns ctx [B*S, H]."""
    d_head = hidden // num_heads
    qkv3 = qkv.reshape(batch, seq, 3 * hidden)   # pure reshape, no transpose
    tq = _pick_tile(seq, 256, 8)
    grid = (batch, seq // tq)
    out = pl.pallas_call(
        functools.partial(_attn_kernel, scale=1.0 / math.sqrt(d_head),
                          num_heads=num_heads, head_dim=d_head, hidden=hidden),
        out_shape=jax.ShapeDtypeStruct((batch, seq, hidden), qkv.dtype),
        grid=grid,
        in_specs=[
            pl.BlockSpec((1, tq, 3 * hidden), lambda b, qi: (b, qi, 0)),
            pl.BlockSpec((1, seq, 3 * hidden), lambda b, qi: (b, 0, 0)),
            pl.BlockSpec((1, 1, seq), lambda b, qi: (b, 0, 0)),
        ],
        out_specs=pl.BlockSpec((1, tq, hidden), lambda b, qi: (b, qi, 0)),
        compiler_params=pltpu.CompilerParams(
            dimension_semantics=("parallel", "parallel"),
            vmem_limit_bytes=_VMEM_LIMIT),
    )(qkv3, qkv3, mask_add_3d)
    return out.reshape(batch * seq, hidden)


# ---------------------------------------------------------------------------
# One Transformer layer, and the BERTEncoder stack
# ---------------------------------------------------------------------------
def prepare_layer_params(p):
    """One-time weight prep (hoisted out of the kernels; amortized when the
    forward is jitted / params are constant): concatenate Q/K/V and transpose
    every weight to [in, out] so kernels use a plain (k,n) contraction."""
    return {
        "wqkv_t": jnp.concatenate([p["wq"], p["wk"], p["wv"]], axis=0).T,  # [H, 3H]
        "bqkv": jnp.concatenate([p["bq"], p["bk"], p["bv"]], axis=0),      # [3H]
        "wo_t": p["wo"].T, "bo": p["bo"],
        "wi_t": p["wi"].T, "bi": p["bi"],
        "wf_t": p["wf"].T, "bf": p["bf"],
        "ln1_g": p["ln1_g"], "ln1_b": p["ln1_b"],
        "ln2_g": p["ln2_g"], "ln2_b": p["ln2_b"],
    }


def transformer_layer(x, mask_add_3d, p, num_heads):
    """x: [B, S, H]; mask_add_3d: [B, 1, S] additive mask."""
    B, S, H = x.shape
    x2 = x.reshape(B * S, H)

    qkv = linear(x2, p["wqkv_t"], p["bqkv"])                    # fused Q/K/V
    ctx = attention(qkv, mask_add_3d, B, S, num_heads, H)       # [B*S, H]

    # attention output projection + residual + LayerNorm, fused
    # TODO(synk): dropout is identity at inference and is omitted here.
    x1 = linear_residual_layernorm(ctx, p["wo_t"], p["bo"], x2,
                                   p["ln1_g"], p["ln1_b"])

    inter = linear(x1, p["wi_t"], p["bi"], activation="gelu")   # FFN up + GELU
    out = linear_residual_layernorm(inter, p["wf_t"], p["bf"], x1,
                                    p["ln2_g"], p["ln2_b"])     # FFN down + LN
    return out.reshape(B, S, H)


def bert_encoder(hidden_states, attention_mask_add, layer_params, num_heads):
    """Mirrors BERTEncoder.forward: returns the list of all layer outputs."""
    B, S, _ = hidden_states.shape
    mask3d = attention_mask_add.reshape(B, 1, S)
    prepped = [prepare_layer_params(p) for p in layer_params]
    all_encoder_layers = []
    for p in prepped:
        hidden_states = transformer_layer(hidden_states, mask3d, p, num_heads)
        all_encoder_layers.append(hidden_states)
    return all_encoder_layers


# ---------------------------------------------------------------------------
# Pure-JAX reference (same math, same GELU approximation, exact division)
# ---------------------------------------------------------------------------
def _ref_layer(x, mask_add, p, num_heads, eps=1e-12):
    B, S, H = x.shape
    dH = H // num_heads
    x2 = x.reshape(B * S, H)

    def lin(t, w, b):
        return t @ w.T + b

    def heads(t):
        return t.reshape(B, S, num_heads, dH).transpose(0, 2, 1, 3)

    q = heads(lin(x2, p["wq"], p["bq"]))
    k = heads(lin(x2, p["wk"], p["bk"]))
    v = heads(lin(x2, p["wv"], p["bv"]))
    s = jnp.einsum("bhqd,bhkd->bhqk", q, k) * (1.0 / math.sqrt(dH))
    s = s + mask_add[:, None, None, :]
    pattn = jax.nn.softmax(s, axis=-1)
    ctx = jnp.einsum("bhqk,bhkd->bhqd", pattn, v).transpose(0, 2, 1, 3).reshape(B * S, H)

    def add_ln(y, r, g, b):
        h = y + r
        mu = jnp.mean(h, axis=-1, keepdims=True)
        hc = h - mu
        var = jnp.mean(hc * hc, axis=-1, keepdims=True)
        return hc * jax.lax.rsqrt(var + eps) * g + b

    x1 = add_ln(lin(ctx, p["wo"], p["bo"]), x2, p["ln1_g"], p["ln1_b"])
    inter = _gelu(lin(x1, p["wi"], p["bi"]))
    out = add_ln(lin(inter, p["wf"], p["bf"]), x1, p["ln2_g"], p["ln2_b"])
    return out.reshape(B, S, H)


def _ref_encoder(hidden_states, mask_add, layer_params, num_heads):
    outs = []
    for p in layer_params:
        hidden_states = _ref_layer(hidden_states, mask_add, p, num_heads)
        outs.append(hidden_states)
    return outs


# ---------------------------------------------------------------------------
# main
# ---------------------------------------------------------------------------
if __name__ == "__main__":
    B, S, H, nH, L = 2, 8, 32, 2, 2
    I = 4 * H  # intermediate size
    key = jax.random.PRNGKey(0)

    def init_layer(k):
        ks = jax.random.split(k, 16)
        n = lambda kk, shape, sc=0.02: sc * jax.random.normal(kk, shape, jnp.float32)
        return {
            "wq": n(ks[0], (H, H)), "bq": n(ks[1], (H,)),
            "wk": n(ks[2], (H, H)), "bk": n(ks[3], (H,)),
            "wv": n(ks[4], (H, H)), "bv": n(ks[5], (H,)),
            "wo": n(ks[6], (H, H)), "bo": n(ks[7], (H,)),
            "ln1_g": 1.0 + n(ks[8], (H,)), "ln1_b": n(ks[9], (H,)),
            "wi": n(ks[10], (I, H)), "bi": n(ks[11], (I,)),
            "wf": n(ks[12], (H, I)), "bf": n(ks[13], (H,)),
            "ln2_g": 1.0 + n(ks[14], (H,)), "ln2_b": n(ks[15], (H,)),
        }

    key, kx, *kl = jax.random.split(key, 2 + L)
    hidden_states = jax.random.normal(kx, (B, S, H), dtype=jnp.float32)
    layer_params = [init_layer(k) for k in kl]

    # Additive attention mask (0 = attend, -10000 = masked), like BERT's
    # extended attention mask that gets added to the scores.
    valid = jnp.array([[1] * S, [1] * (S - 2) + [0, 0]], dtype=jnp.float32)
    attention_mask_add = (1.0 - valid) * -10000.0        # [B, S]

    outs = bert_encoder(hidden_states, attention_mask_add, layer_params, nH)
    outs = jax.block_until_ready(outs)

    refs = _ref_encoder(hidden_states, attention_mask_add, layer_params, nH)

    assert len(outs) == L
    for o, r in zip(outs, refs):
        assert o.shape == (B, S, H)
        err = float(jnp.max(jnp.abs(o - r)))
        # 1e-3 tolerance: the only intended numerical deviation from the pure-JAX
        # reference is the EUP approximate reciprocal in the softmax normalization.
        assert err < 1e-3, err

    print("KERNEL_OK")
</pallas_src>

<mosaic_0001>
module attributes {stable_mosaic.version = 11 : i64} {
  func.func @_linear_kernel(%arg0: i32, %arg1: i32, %arg2: i32, %arg3: memref<16x32xf32, #tpu.memory_space<vmem>>, %arg4: memref<32x96xf32, #tpu.memory_space<vmem>>, %arg5: memref<1x96xf32, #tpu.memory_space<vmem>>, %arg6: memref<16x96xf32, #tpu.memory_space<vmem>>, %arg7: memref<16x96xf32, #tpu.memory_space<vmem>>) attributes {dimension_semantics = [#tpu.dimension_semantics<parallel>, #tpu.dimension_semantics<parallel>, #tpu.dimension_semantics<arbitrary>], iteration_bounds = array<i64: 1, 1, 1>, scalar_prefetch = 0 : i64, scratch_operands = 1 : i64, tpu.core_type = #tpu.core_type<tc>, window_params = [{transform_indices = @transform_0, window_bounds = array<i64: 16, 32>}, {transform_indices = @transform_1, window_bounds = array<i64: 32, 96>}, {transform_indices = @transform_2, window_bounds = array<i64: 1, 96>}, {transform_indices = @transform_3, window_bounds = array<i64: 16, 96>}]} {
    %c0_i32 = arith.constant 0 : i32
    %0 = arith.cmpi eq, %arg2, %c0_i32 : i32
    %1 = arith.extui %0 : i1 to i32
    %c0_i32_0 = arith.constant 0 : i32
    %2 = arith.cmpi ne, %1, %c0_i32_0 : i32
    scf.if %2 {
      %cst_10 = arith.constant 0.000000e+00 : f32
      %12 = vector.broadcast %cst_10 : f32 to vector<16x96xf32>
      %c0_11 = arith.constant 0 : index
      %c0_12 = arith.constant 0 : index
      %13 = vector.load %arg7[%c0_11, %c0_12] : memref<16x96xf32, #tpu.memory_space<vmem>>, vector<16x96xf32>
      tpu.vector_store %arg7[%c0_11, %c0_12], %12 {strides = array<i32>} : memref<16x96xf32, #tpu.memory_space<vmem>>, vector<16x96xf32>,
    } else {
    }
    %c0 = arith.constant 0 : index
    %c0_1 = arith.constant 0 : index
    %3 = vector.load %arg7[%c0, %c0_1] : memref<16x96xf32, #tpu.memory_space<vmem>>, vector<16x96xf32>
    %c0_2 = arith.constant 0 : index
    %c0_3 = arith.constant 0 : index
    %4 = vector.load %arg3[%c0_2, %c0_3] : memref<16x32xf32, #tpu.memory_space<vmem>>, vector<16x32xf32>
    %c0_4 = arith.constant 0 : index
    %c0_5 = arith.constant 0 : index
    %5 = vector.load %arg4[%c0_4, %c0_5] : memref<32x96xf32, #tpu.memory_space<vmem>>, vector<32x96xf32>
    %cst = arith.constant dense<0.000000e+00> : vector<16x96xf32>
    %6 = tpu.matmul %4, %5, %cst {dimension_numbers = #tpu.dot_dimension_numbers<[1], [0], [0], [1], [0, 0, 1, 1], [], []>} : vector<16x32xf32>, vector<32x96xf32>, vector<16x96xf32> -> vector<16x96xf32>
    %7 = arith.addf %3, %6 : vector<16x96xf32>
    %c0_6 = arith.constant 0 : index
    %c0_7 = arith.constant 0 : index
    %8 = vector.load %arg7[%c0_6, %c0_7] : memref<16x96xf32, #tpu.memory_space<vmem>>, vector<16x96xf32>
    tpu.vector_store %arg7[%c0_6, %c0_7], %7 {strides = array<i32>} : memref<16x96xf32, #tpu.memory_space<vmem>>, vector<16x96xf32>,
    %c0_i32_8 = arith.constant 0 : i32
    %9 = arith.cmpi eq, %arg2, %c0_i32_8 : i32
    %10 = arith.extui %9 : i1 to i32
    %c0_i32_9 = arith.constant 0 : i32
    %11 = arith.cmpi ne, %10, %c0_i32_9 : i32
    scf.if %11 {
      %c0_10 = arith.constant 0 : index
      %c0_11 = arith.constant 0 : index
      %12 = vector.load %arg7[%c0_10, %c0_11] : memref<16x96xf32, #tpu.memory_space<vmem>>, vector<16x96xf32>
      %c0_12 = arith.constant 0 : index
      %c0_13 = arith.constant 0 : index
      %13 = vector.load %arg5[%c0_12, %c0_13] : memref<1x96xf32, #tpu.memory_space<vmem>>, vector<1x96xf32>
      %14 = vector.broadcast %13 : vector<1x96xf32> to vector<16x96xf32>
      %15 = arith.addf %12, %14 : vector<16x96xf32>
      %c0_14 = arith.constant 0 : index
      %c0_15 = arith.constant 0 : index
      %16 = vector.load %arg6[%c0_14, %c0_15] : memref<16x96xf32, #tpu.memory_space<vmem>>, vector<16x96xf32>
      tpu.vector_store %arg6[%c0_14, %c0_15], %15 {strides = array<i32>} : memref<16x96xf32, #tpu.memory_space<vmem>>, vector<16x96xf32>,
    } else {
    }
    return
  }
  func.func @transform_0(%arg0: i32, %arg1: i32, %arg2: i32) -> (i32, i32) {
    %c0_i32 = arith.constant 0 : i32
    return %arg0, %arg2 : i32, i32
  }
  func.func @transform_1(%arg0: i32, %arg1: i32, %arg2: i32) -> (i32, i32) {
    %c0_i32 = arith.constant 0 : i32
    return %arg2, %arg1 : i32, i32
  }
  func.func @transform_2(%arg0: i32, %arg1: i32, %arg2: i32) -> (i32, i32) {
    %c0_i32 = arith.constant 0 : i32
    %c0_i32_0 = arith.constant 0 : i32
    return %c0_i32, %arg1 : i32, i32
  }
  func.func @transform_3(%arg0: i32, %arg1: i32, %arg2: i32) -> (i32, i32) {
    %c0_i32 = arith.constant 0 : i32
    return %arg0, %arg1 : i32, i32
  }
}

</mosaic_0001>

<bundles_post_ra>
// kernel: tpu_custom_call.1
= control target key start
LH: loop header
LB: loop body
LE: loop exit
PB: predicated region body
PF: predicated region fallthrough
CT: control target
= control target key end

     0   :  { %8 = vsyncpa [#allocation4], 0  ;;  %s365_s0 = inlined_call_operand.hbm [shape: f32[16,32], index: 0, kind: input, shape index: {}]   ;;  %s366_s1 = inlined_call_operand.hbm [shape: f32[32,96], index: 1, kind: input, shape index: {}]   ;;  %s367_s2 = inlined_call_operand.vmem [shape: f32[1,96], index: 2, kind: input, shape index: {}]   ;;  %s368_s3 = inlined_call_operand.hbm [shape: f32[16,96], index: 3, kind: output, shape index: {}]  }
   0x1   :  { %9 = vsyncpa [#allocation7], 0 }
   0x2   :  { %10 = vsyncpa [#allocation5], 0  ;;  %s285_s12 = smov [#allocation3]   ;;  %s213_s16 = scalar_lea.hbm %s365_s0, 256 }
   0x3   :  { %s16_s13 = sshll.u32 %s285_s12, 4  ;;  %p214_p0 = scmp.ne.s32.totalorder %s365_s0, %s213_s16  ;;  %s17_s13 = int_to_ptr.vmem [resolvable:$true] %s16_s13 }
   0x4   :  { %p217_p1 = scmp.lt.u32.totalorder %s213_s16, %s365_s0 }
   0x6   :  { %p219_p2 = pnand %p217_p1, %p214_p0 }
   0x8   :  { %222 = shalt.err (!%p219_p2)
}
   0x9   :  { %s223_s21 = scalar_lea.vmem %s17_s13, 256  ;;  %p228_p4 = scmp.lt.s32.totalorder %s17_s13, %s17_s13 }
   0xa   :  { %p224_p3 = scmp.ne.s32.totalorder %s17_s13, %s223_s21  ;;  %p229_p5 = scmp.lt.s32.totalorder %s223_s21, %s223_s21 }
   0xc   :  { %p230_p6 = por %p229_p5, %p228_p4 }
   0xe   :  { %p231_p7 = pnand %p230_p6, %p224_p3 }
  0x10   :  { %234 = shalt.err (!%p231_p7)
}
  0x11   :  { %s286_s22 = smov 128   ;;  %s287_s23 = smov 8  }
  0x12   :  { %22 = dma.hbm_to_vmem [thread:$0]  %s365_s0, 256, %s17_s13, [#allocation4], %s286_s22, %s286_s22, %s287_s23  }
  0x13   :  { %s288_s26 = smov [#allocation6]   ;;  %s235_s30 = scalar_lea.hbm %s366_s1, 512 }
  0x14   :  { %s28_s27 = sshll.u32 %s288_s26, 4  ;;  %p236_p8 = scmp.ne.s32.totalorder %s366_s1, %s235_s30  ;;  %s29_s27 = int_to_ptr.vmem [resolvable:$true] %s28_s27 }
  0x15   :  { %p239_p9 = scmp.lt.u32.totalorder %s235_s30, %s366_s1 }
  0x17   :  { %p241_p10 = pnand %p239_p9, %p236_p8 }
  0x19   :  { %244 = shalt.err (!%p241_p10)
}
  0x1a   :  { %s245_s8 = scalar_lea.vmem %s29_s27, 512  ;;  %p250_p12 = scmp.lt.s32.totalorder %s29_s27, %s29_s27 }
  0x1b   :  { %p246_p11 = scmp.ne.s32.totalorder %s29_s27, %s245_s8  ;;  %p251_p13 = scmp.lt.s32.totalorder %s245_s8, %s245_s8 }
  0x1d   :  { %p252_p0 = por %p251_p13, %p250_p12 }
  0x1f   :  { %p253_p1 = pnand %p252_p0, %p246_p11 }
  0x21   :  { %256 = shalt.err (!%p253_p1)
}
  0x22   :  { %34 = dma.hbm_to_vmem [thread:$0]  %s366_s1, 512, %s29_s27, [#allocation7], %s286_s22, %s286_s22, %s287_s23  }
  0x23   :  { %279 = dma.done.wait [#allocation4], 256  }
  0x24   :  { %280 = vsyncadd [#allocation4], 4294967040 }
  0x25   :  { %281 = dma.done.wait [#allocation7], 512  }
  0x26   :  { %282 = vsyncadd [#allocation7], 4294966784  ;;  %vm47_vm0 = vcmask 785408   ;;  %v289_v0 = vmov 0.0   ;;  %vm58_vm1 = vcmask 261120   ;;  %v54_v1 = vld [vmem:[#allocation6] sm:$0xff] }
  0x27   :  { %49 = vst.msk [vmem:[#allocation2 + $0x8] sm:$0xff] %vm47_vm0, %v289_v0  ;;  %48 = vst.msk [vmem:[#allocation2] sm:$0xff] %vm47_vm0, %v289_v0  ;;  %v55_v2 = vld [vmem:[#allocation6 + $0x8] sm:$0xff]  ;;  %v56_v3 = vld [vmem:[#allocation6 + $0x10] sm:$0xff]  ;;  %s290_s11 = smov [#allocation8]  }
  0x28   :  { %v199_v4 = vpack.c.bf16 %v55_v2, %v54_v1  ;;  %v57_v5 = vld [vmem:[#allocation6 + $0x18] sm:$0xff]  ;;  %v52_v6 = vld [vmem:[#allocation3] sm:$0xff]  ;;  %v181_v15 = vld [vmem:[%s367_s2] ss:$0 sm:$0xff]  ;;  %s166_s12 = sshll.u32 %s290_s11, 4  ;;  %s167_s12 = int_to_ptr.vmem [resolvable:$true] %s166_s12 }
  0x29   :  { %v203_v7 = vpack.c.bf16 %v57_v5, %v56_v3  ;;  %196 = vmatprep.mubr.msk.f32.mxu0 %vm58_vm1, %v52_v6  ;;  %v53_v8 = vld [vmem:[#allocation3 + $0x8] sm:$0xff]  ;;  %s257_s13 = scalar_lea.vmem %s167_s12, 256  ;;  %p262_p3 = scmp.lt.s32.totalorder %s167_s12, %s167_s12 }
  0x2a   :  { %200 = vmatprep.subr.bf16.mxu0 %v199_v4  ;;  %p258_p2 = scmp.ne.s32.totalorder %s167_s12, %s257_s13  ;;  %p263_p4 = scmp.lt.s32.totalorder %s257_s13, %s257_s13 }
  0x2b   :  { %202 = vmatpush3.bf16.msra.mxu0 %v199_v4 }
  0x2c   :  { %204 = vmatprep.subr.bf16.mxu0 %v203_v7  ;;  %p264_p5 = por %p263_p4, %p262_p3 }
  0x2e   :  { %v51_v9 = vld [vmem:[#allocation2 + $0x8] sm:$0xff]  ;;  %v50_v10 = vld [vmem:[#allocation2] sm:$0xff]  ;;  %p265_p6 = pnand %p264_p5, %p258_p2 }
  0x2f   :  { %206 = vmatpush3.bf16.msra.mxu0 %v203_v7 }
  0x32   :  { %197 = vmatmul.mubr.msk.f32.vlgmr.msra.gmra.mrb[0].mxu0 %vm58_vm1, %v53_v8 }
 0x105   :  { %v198_v11 = vpop.f32.mrb[0].mxu0 }
 0x106   :  { %v141_v12 = vadd.f32 %v198_v11, %v51_v9  ;;  %v131_v13 = vpop.f32.mrb[1].mxu0 }
 0x107   :  { %v140_v14 = vadd.f32 %v131_v13, %v50_v10 }
 0x108   :  { %144 = vst.msk [vmem:[#allocation2 + $0x8] sm:$0xff] %vm47_vm0, %v141_v12 }
 0x109   :  { %143 = vst.msk [vmem:[#allocation2] sm:$0xff] %vm47_vm0, %v140_v14 }
 0x10f   :  { %v149_v16 = vld [vmem:[#allocation2 + $0x8] sm:$0xff] }
 0x110   :  { %v148_v17 = vld [vmem:[#allocation2] sm:$0xff]  ;;  %v158_v18 = vadd.f32 %v181_v15, %v149_v16 }
 0x111   :  { %v157_v19 = vadd.f32 %v181_v15, %v148_v17 }
 0x112   :  { %160 = vst.msk [vmem:[#allocation8 + $0x8] sm:$0xff] %vm47_vm0, %v158_v18 }
 0x113   :  { %159 = vst.msk [vmem:[#allocation8] sm:$0xff] %vm47_vm0, %v157_v19 }
 0x114   :  { %268 = shalt.err (!%p265_p6)
}
 0x115   :  { %s269_s15 = scalar_lea.hbm %s368_s3, 256 }
 0x116   :  { %p270_p7 = scmp.ne.s32.totalorder %s368_s3, %s269_s15  ;;  %p273_p8 = scmp.lt.u32.totalorder %s269_s15, %s368_s3 }
 0x118   :  { %p275_p9 = pnand %p273_p8, %p270_p7 }
 0x11a   :  { %278 = shalt.err (!%p275_p9)
}
 0x11b   :  { %172 = dma.vmem_to_hbm [thread:$0]  %s167_s12, 256, %s368_s3, [#allocation5], %s286_s22, %s286_s22, %s287_s23  }
 0x11c   :  { %283 = dma.done.wait [#allocation5], 256  }
 0x11d   :  { %284 = vsyncadd [#allocation5], 4294967040 }
 0x11e   :  { %176 = vsyncpa [#allocation4], 1 }
 0x11f   :  { %177 = vsyncpa [#allocation7], 1 }
 0x120   :  { %178 = vsyncpa [#allocation5], 1 }

</bundles_post_ra>
